<compile_context>
chip_gen: v7x
topology: tpu7x:2x2x1
jax: 0.10.0
libtpu: 0.0.40
codegen_flags: <defaults>
</compile_context>

<pallas_src>
from functools import partial

import jax
import jax.numpy as jnp
from jax import lax
from jax.experimental import pallas as pl
from jax.experimental.pallas import tpu as pltpu


# --------------------------------------------------------------------------
# helpers
# --------------------------------------------------------------------------

def _round_up(x: int, m: int) -> int:
    return ((x + m - 1) // m) * m


def _pack_columns(columns, Rp: int) -> jnp.ndarray:
    """Pack C (B,1)/(B,) columns into a lane-dense (C, Rp, 128) slab.

    Transpose-free: per column -> flatten (free), pad (contiguous copy),
    reshape to (Rp, 128) (free), then one contiguous stack.
    Batch index b maps to (row=b//128, lane=b%128).
    """
    Bp = Rp * 128
    packed = []
    for c in columns:
        col = jnp.asarray(c, dtype=jnp.float32).reshape(-1)        # (B,)
        col = jnp.pad(col, (0, Bp - col.shape[0]))                  # (Bp,)
        packed.append(col.reshape(Rp, 128))
    return jnp.stack(packed, axis=0)                                # (C,Rp,128)


def _unpack_columns(packed: jnp.ndarray, B: int):
    """Inverse of _pack_columns: (C, Rp, 128) -> list of C (B, 1) columns."""
    C, Rp, L = packed.shape
    return [packed[c].reshape(Rp * L)[:B].reshape(B, 1) for c in range(C)]


# --------------------------------------------------------------------------
# kernels
# --------------------------------------------------------------------------

def _lv_rhs_kernel(theta_ref, state_ref, dstate_ref):
    # theta_ref : (4, TR, 128)  rows = alpha, beta, gamma, delta
    # state_ref : (2, TR, 128)  rows = prey, predator
    # dstate_ref: (2, TR, 128)  rows = dprey, dpredator
    alpha = theta_ref[0]
    beta = theta_ref[1]
    gamma = theta_ref[2]
    delta = theta_ref[3]
    prey = state_ref[0]
    pred = state_ref[1]

    # Factored form (fewer VALU ops; identical math to the torch reference).
    dstate_ref[0] = prey * (alpha - beta * pred)
    dstate_ref[1] = pred * (delta * prey - gamma)


def _make_euler_kernel(n_steps: int, dt: float, tile_rows: int):
    """Fused forward-Euler integrator, chunk-outer / time-inner.

    For each (chunk_rows x 128) sub-tile the prey/pred carry and dt-folded
    parameters live in vregs across all n_steps; the chunk is written back
    once after the time loop.
    """
    dt = float(dt)
    n_steps = int(n_steps)
    chunk_rows = 32 if tile_rows % 32 == 0 else 8
    n_chunks = tile_rows // chunk_rows
    unroll = n_steps if 0 < n_steps <= 32 else 8

    def run_chunk(theta_ref, state0_ref, out_ref, r0):
        a = theta_ref[0, pl.ds(r0, chunk_rows), :]
        b = theta_ref[1, pl.ds(r0, chunk_rows), :]
        g = theta_ref[2, pl.ds(r0, chunk_rows), :]
        d = theta_ref[3, pl.ds(r0, chunk_rows), :]

        # Fold dt once per chunk (outside the time loop).
        A = 1.0 + dt * a        # 1 + dt*alpha
        Bc = dt * b             # dt*beta
        G = 1.0 - dt * g        # 1 - dt*gamma
        D = dt * d              # dt*delta

        prey0 = state0_ref[0, pl.ds(r0, chunk_rows), :]
        pred0 = state0_ref[1, pl.ds(r0, chunk_rows), :]

        def step(_, carry):
            prey, pred = carry
            # Explicit Euler; predator update uses the PRE-update prey.
            prey_new = prey * (A - Bc * pred)
            pred_new = pred * (G + D * prey)
            return prey_new, pred_new

        prey, pred = lax.fori_loop(0, n_steps, step, (prey0, pred0),
                                   unroll=unroll)
        out_ref[0, pl.ds(r0, chunk_rows), :] = prey
        out_ref[1, pl.ds(r0, chunk_rows), :] = pred

    def kernel(theta_ref, state0_ref, out_ref):
        if n_chunks == 1:
            run_chunk(theta_ref, state0_ref, out_ref, 0)
        else:
            @pl.loop(0, n_chunks)
            def _(c):
                r0 = pl.multiple_of(c * chunk_rows, chunk_rows)
                run_chunk(theta_ref, state0_ref, out_ref, r0)

    return kernel


# --------------------------------------------------------------------------
# pallas_call wrapper
# --------------------------------------------------------------------------

def _lv_pallas_call(kernel, theta_packed, state_packed, tile_rows,
                    alias_state_to_out=False):
    _, Rp, _ = theta_packed.shape
    grid = (pl.cdiv(Rp, tile_rows),)   # ragged last block handled by Pallas
    extra = {}
    if alias_state_to_out:
        extra["input_output_aliases"] = {1: 0}   # state input -> output
    return pl.pallas_call(
        kernel,
        out_shape=jax.ShapeDtypeStruct((2, Rp, 128), jnp.float32),
        grid_spec=pltpu.PrefetchScalarGridSpec(
            num_scalar_prefetch=0,
            grid=grid,
            in_specs=[
                pl.BlockSpec((4, tile_rows, 128), lambda i: (0, i, 0)),
                pl.BlockSpec((2, tile_rows, 128), lambda i: (0, i, 0)),
            ],
            out_specs=pl.BlockSpec((2, tile_rows, 128), lambda i: (0, i, 0)),
        ),
        compiler_params=pltpu.CompilerParams(
            dimension_semantics=("parallel",)),
        **extra,
    )(theta_packed, state_packed)


# Jitted end-to-end paths (pack -> pallas_call -> unpack in one XLA program).
@partial(jax.jit, static_argnames=("tile_rows",))
def _rhs_forward(theta_packed, prey, pred, *, tile_rows):
    B = prey.shape[0]
    Rp = theta_packed.shape[1]
    state_packed = _pack_columns([prey, pred], Rp)
    d = _lv_pallas_call(_lv_rhs_kernel, theta_packed, state_packed, tile_rows)
    dprey, dpred = _unpack_columns(d, B)
    return dprey, dpred


@partial(jax.jit, static_argnames=("tile_rows", "n_steps", "dt"))
def _euler_forward(theta_packed, prey, pred, *, tile_rows, n_steps, dt):
    B = prey.shape[0]
    Rp = theta_packed.shape[1]
    state_packed = _pack_columns([prey, pred], Rp)
    kernel = _make_euler_kernel(n_steps, dt, tile_rows)
    out = _lv_pallas_call(kernel, theta_packed, state_packed, tile_rows,
                          alias_state_to_out=True)
    prey_T, pred_T = _unpack_columns(out, B)
    return prey_T, pred_T


# --------------------------------------------------------------------------
# module
# --------------------------------------------------------------------------

class LotkaVolterraODE:
    """JAX/Pallas port of the PyTorch LotkaVolterraODE module.

    tile_rows: max rows (of 128 lanes) per grid block.  Block footprint is
    (4+2+2) * tile_rows * 128 * 4 B = 4 KiB * tile_rows; at the default 1024
    that is ~4 MiB (~8 MiB double-buffered), under v5e's 16 MiB scoped-VMEM
    default and far under v6e/v7x's 32 MiB.  tile_rows is additionally capped
    at ~Rp/2 so the grid has >= 2 "parallel" blocks when the batch allows
    (both v7x TensorCores get work).
    """

    def __init__(self, x0: float = 1.0, x1: float = 1.0,
                 tile_rows: int = 1024) -> None:
        self._tile_rows_max = max(8, _round_up(int(tile_rows), 8))
        self.x0 = jnp.asarray(x0, dtype=jnp.float32)
        self.x1 = jnp.asarray(x1, dtype=jnp.float32)
        # Default buffers: alpha=beta=gamma=delta=1, batch_size=1.
        self.set_theta(jnp.ones((1, 4), dtype=jnp.float32))

    # -- parameters -------------------------------------------------------
    def set_theta(self, theta: jnp.ndarray) -> None:
        theta = jnp.asarray(theta, dtype=jnp.float32).reshape(-1, 4)
        B = theta.shape[0]
        self.batch_size = B

        # (B,1) views kept for API compatibility with the torch module.
        self.alpha = theta[:, 0:1]
        self.beta = theta[:, 1:2]
        self.gamma = theta[:, 2:3]
        self.delta = theta[:, 3:4]

        # Lane-dense packed layout (batch -> (row, lane)), computed once per
        # set_theta and reused for every RHS evaluation.
        R0 = -(-B // 128)
        Rp = _round_up(R0, 8)
        # Cap tile_rows at ~Rp/2 (rounded to 8) so grid >= 2 when possible.
        half = _round_up(pl.cdiv(Rp, 2), 8)
        self._tile_rows = max(8, min(self._tile_rows_max, half, Rp))
        self._Rp = Rp
        self._theta_packed = _pack_columns(
            [self.alpha, self.beta, self.gamma, self.delta], Rp)

    # -- initial state ----------------------------------------------------
    def get_initial_state(self):
        prey0 = jnp.tile(self.x0.reshape(1, 1), (self.batch_size, 1))
        pred0 = jnp.tile(self.x1.reshape(1, 1), (self.batch_size, 1))
        return (prey0, pred0)

    # -- single RHS evaluation (== torch forward) -------------------------
    def __call__(self, t, state):
        prey, predator = state
        dprey, dpred = _rhs_forward(self._theta_packed, prey, predator,
                                    tile_rows=self._tile_rows)
        return (dprey, dpred)

    # -- fused multi-step Euler integrator (one launch, vreg-resident state)
    def simulate_euler(self, state, n_steps: int, dt: float):
        prey, predator = state
        prey_T, pred_T = _euler_forward(self._theta_packed, prey, predator,
                                        tile_rows=self._tile_rows,
                                        n_steps=int(n_steps), dt=float(dt))
        return (prey_T, pred_T)


# --------------------------------------------------------------------------
# demo / self-check
# --------------------------------------------------------------------------

if __name__ == "__main__":
    key = jax.random.PRNGKey(0)
    k_theta, k_state = jax.random.split(key)

    # Batch deliberately not a multiple of 128 so padding / ragged-block paths
    # are exercised; tile_rows=8 forces a multi-block grid even at this size
    # (Rp=16 rows -> grid=(2,), "parallel").
    B = 1500
    theta = jax.random.uniform(k_theta, (B, 4), dtype=jnp.float32,
                               minval=0.1, maxval=2.0)
    state_noise = jax.random.uniform(k_state, (B, 2), dtype=jnp.float32,
                                     minval=0.5, maxval=1.5)

    model = LotkaVolterraODE(x0=1.0, x1=1.0, tile_rows=8)
    model.set_theta(theta)

    prey0, pred0 = model.get_initial_state()
    prey = prey0 * state_noise[:, 0:1]
    predator = pred0 * state_noise[:, 1:2]

    # ---- single RHS evaluation (torch forward semantics) ----------------
    dprey, dpred = model(0.0, (prey, predator))
    jax.block_until_ready((dprey, dpred))

    ref_dprey = model.alpha * prey - model.beta * prey * predator
    ref_dpred = model.delta * prey * predator - model.gamma * predator
    assert dprey.shape == (B, 1) and dpred.shape == (B, 1)
    assert jnp.allclose(dprey, ref_dprey, atol=1e-5, rtol=1e-5)
    assert jnp.allclose(dpred, ref_dpred, atol=1e-5, rtol=1e-5)

    # ---- fused Euler integrator (N RHS evals in one pallas_call) --------
    n_steps, dt = 16, 0.02
    prey_T, pred_T = model.simulate_euler((prey, predator),
                                          n_steps=n_steps, dt=dt)
    jax.block_until_ready((prey_T, pred_T))

    rp, rq = prey, predator
    for _ in range(n_steps):
        pp = rp * rq
        dp = model.alpha * rp - model.beta * pp
        dq = model.delta * pp - model.gamma * rq
        rp = rp + dt * dp
        rq = rq + dt * dq
    assert prey_T.shape == (B, 1) and pred_T.shape == (B, 1)
    assert jnp.allclose(prey_T, rp, atol=1e-4, rtol=1e-4)
    assert jnp.allclose(pred_T, rq, atol=1e-4, rtol=1e-4)

    print("KERNEL_OK")
</pallas_src>

<mosaic_0001>
module attributes {stable_mosaic.version = 11 : i64} {
  func.func @_lv_rhs_kernel(%arg0: i32, %arg1: memref<4x8x128xf32, #tpu.memory_space<vmem>>, %arg2: memref<2x8x128xf32, #tpu.memory_space<vmem>>, %arg3: memref<2x8x128xf32, #tpu.memory_space<vmem>>) attributes {dimension_semantics = [#tpu.dimension_semantics<parallel>], iteration_bounds = array<i64: 2>, scalar_prefetch = 0 : i64, scratch_operands = 0 : i64, tpu.core_type = #tpu.core_type<tc>, window_params = [{transform_indices = @transform_0, window_bounds = array<i64: 4, 8, 128>}, {transform_indices = @transform_1, window_bounds = array<i64: 2, 8, 128>}, {transform_indices = @transform_2, window_bounds = array<i64: 2, 8, 128>}]} {
    %c0 = arith.constant 0 : index
    %c0_0 = arith.constant 0 : index
    %c0_1 = arith.constant 0 : index
    %0 = vector.load %arg1[%c0, %c0_0, %c0_1] : memref<4x8x128xf32, #tpu.memory_space<vmem>>, vector<1x8x128xf32>
    %1 = vector.shape_cast %0 : vector<1x8x128xf32> to vector<8x128xf32>
    %c1 = arith.constant 1 : index
    %c0_2 = arith.constant 0 : index
    %c0_3 = arith.constant 0 : index
    %2 = vector.load %arg1[%c1, %c0_2, %c0_3] : memref<4x8x128xf32, #tpu.memory_space<vmem>>, vector<1x8x128xf32>
    %3 = vector.shape_cast %2 : vector<1x8x128xf32> to vector<8x128xf32>
    %c2 = arith.constant 2 : index
    %c0_4 = arith.constant 0 : index
    %c0_5 = arith.constant 0 : index
    %4 = vector.load %arg1[%c2, %c0_4, %c0_5] : memref<4x8x128xf32, #tpu.memory_space<vmem>>, vector<1x8x128xf32>
    %5 = vector.shape_cast %4 : vector<1x8x128xf32> to vector<8x128xf32>
    %c3 = arith.constant 3 : index
    %c0_6 = arith.constant 0 : index
    %c0_7 = arith.constant 0 : index
    %6 = vector.load %arg1[%c3, %c0_6, %c0_7] : memref<4x8x128xf32, #tpu.memory_space<vmem>>, vector<1x8x128xf32>
    %7 = vector.shape_cast %6 : vector<1x8x128xf32> to vector<8x128xf32>
    %c0_8 = arith.constant 0 : index
    %c0_9 = arith.constant 0 : index
    %c0_10 = arith.constant 0 : index
    %8 = vector.load %arg2[%c0_8, %c0_9, %c0_10] : memref<2x8x128xf32, #tpu.memory_space<vmem>>, vector<1x8x128xf32>
    %9 = vector.shape_cast %8 : vector<1x8x128xf32> to vector<8x128xf32>
    %c1_11 = arith.constant 1 : index
    %c0_12 = arith.constant 0 : index
    %c0_13 = arith.constant 0 : index
    %10 = vector.load %arg2[%c1_11, %c0_12, %c0_13] : memref<2x8x128xf32, #tpu.memory_space<vmem>>, vector<1x8x128xf32>
    %11 = vector.shape_cast %10 : vector<1x8x128xf32> to vector<8x128xf32>
    %12 = arith.mulf %3, %11 : vector<8x128xf32>
    %13 = arith.subf %1, %12 : vector<8x128xf32>
    %14 = arith.mulf %9, %13 : vector<8x128xf32>
    %c0_14 = arith.constant 0 : index
    %c0_15 = arith.constant 0 : index
    %c0_16 = arith.constant 0 : index
    %15 = vector.load %arg3[%c0_14, %c0_15, %c0_16] : memref<2x8x128xf32, #tpu.memory_space<vmem>>, vector<1x8x128xf32>
    %16 = vector.shape_cast %15 : vector<1x8x128xf32> to vector<8x128xf32>
    %17 = vector.shape_cast %14 : vector<8x128xf32> to vector<1x8x128xf32>
    tpu.vector_store %arg3[%c0_14, %c0_15, %c0_16], %17 {strides = array<i32>} : memref<2x8x128xf32, #tpu.memory_space<vmem>>, vector<1x8x128xf32>,
    %18 = arith.mulf %7, %9 : vector<8x128xf32>
    %19 = arith.subf %18, %5 : vector<8x128xf32>
    %20 = arith.mulf %11, %19 : vector<8x128xf32>
    %c1_17 = arith.constant 1 : index
    %c0_18 = arith.constant 0 : index
    %c0_19 = arith.constant 0 : index
    %21 = vector.load %arg3[%c1_17, %c0_18, %c0_19] : memref<2x8x128xf32, #tpu.memory_space<vmem>>, vector<1x8x128xf32>
    %22 = vector.shape_cast %21 : vector<1x8x128xf32> to vector<8x128xf32>
    %23 = vector.shape_cast %20 : vector<8x128xf32> to vector<1x8x128xf32>
    tpu.vector_store %arg3[%c1_17, %c0_18, %c0_19], %23 {strides = array<i32>} : memref<2x8x128xf32, #tpu.memory_space<vmem>>, vector<1x8x128xf32>,
    return
  }
  func.func @transform_0(%arg0: i32) -> (i32, i32, i32) {
    %c0_i32 = arith.constant 0 : i32
    %c0_i32_0 = arith.constant 0 : i32
    %c0_i32_1 = arith.constant 0 : i32
    return %c0_i32, %arg0, %c0_i32_0 : i32, i32, i32
  }
  func.func @transform_1(%arg0: i32) -> (i32, i32, i32) {
    %c0_i32 = arith.constant 0 : i32
    %c0_i32_0 = arith.constant 0 : i32
    %c0_i32_1 = arith.constant 0 : i32
    return %c0_i32, %arg0, %c0_i32_0 : i32, i32, i32
  }
  func.func @transform_2(%arg0: i32) -> (i32, i32, i32) {
    %c0_i32 = arith.constant 0 : i32
    %c0_i32_0 = arith.constant 0 : i32
    %c0_i32_1 = arith.constant 0 : i32
    return %c0_i32, %arg0, %c0_i32_0 : i32, i32, i32
  }
}

</mosaic_0001>

<bundles_post_ra>
// kernel: _rhs_forward.1
= control target key start
LH: loop header
LB: loop body
LE: loop exit
PB: predicated region body
PF: predicated region fallthrough
CT: control target
= control target key end

     0   :  { %s464_s9 = smov 0   ;;  %s466_s10 = smov 0   ;;  %s537_s0 = inlined_call_operand.vmem [shape: f32[4,16,128], index: 0, kind: input, shape index: {}]   ;;  %s538_s1 = inlined_call_operand.vmem [shape: f32[2,16,128], index: 1, kind: input, shape index: {}]   ;;  %s539_s2 = inlined_call_operand.vmem [shape: f32[2,16,128], index: 2, kind: output, shape index: {}]  }
   0x1   :  { %s468_s11 = smov 0  }
   0x2 LB: > { %s380_s12 = sadd.s32 4294967295, %s447_s11   ;;  %s481_s13 = sadd.s32 1, %s447_s11   ;;  %s447_s11 = sphi %s468_s11, %s544_s11   ;;  %s443_s10 = sphi %s466_s10, %s543_s10   ;;  %s439_s9 = sphi %s464_s9, %s542_s9  }
   0x3   : > { %s16_s14 = ssub.s32 %s447_s11, %s481_s13  ;;  %s19_s15 = sadd.s32 1, %s443_s10 }
   0x4   : > { %p17_p0 = scmp.eq.s32.totalorder %s16_s14, 0  ;;  %p26_p1 = scmp.ne.s32.totalorder %s443_s10, %s439_s9 }
   0x5   : > { %p27_p2 = scmp.eq.s32.totalorder %s447_s11, 0  ;;  %p82_p3 = scmp.eq.s32.totalorder %s380_s12, 1 }
   0x6   : > { %s492_s16 = scalar_select %p17_p0, %s443_s10, %s19_s15  }
   0x7   : > { %p494_p4 = por %p27_p2, %p26_p1  ;;  %p498_p5 = por %p82_p3, %p26_p1 }
   0x8   : > { %p383_p6 = scmp.ge.s32.totalorder %s447_s11, 2 }
   0xa   : > { %104 = sbr.rel (%p383_p6) target bundleno = 31 (0x1f), region = 16 }
  0x11   : > { %107 = sbr.rel (!%p494_p4) target bundleno = 24 (0x18), region = 20  ;;  %s109_s19 = sand.u32 (%p494_p4), 1, %s443_s10  }
  0x12   : > { %s385_s20 = sshll.u32 (%p494_p4), %s447_s11, 3  ;;  %s384_s21 = sshll.u32 (%p494_p4), %s109_s19, 5 }
  0x13   : > { %s113_s24 = scalar_lea.vmem (%p494_p4), %s537_s0, %s385_s20  ;;  %s111_s25 = scalar_lea.vmem (%p494_p4), [#allocation2], %s384_s21 }
  0x14   : > { %v147_v0 = vld [vmem:[%s113_s24] sm:$0xff] (%p494_p4)  ;;  %v149_v1 = vld [vmem:[%s113_s24 + $0x10] sm:$0xff] (%p494_p4) }
  0x15   : > { %v151_v2 = vld [vmem:[%s113_s24 + $0x20] sm:$0xff] (%p494_p4)  ;;  %148 = vst [vmem:[%s111_s25] sm:$0xff] (%p494_p4), %v147_v0  ;;  %150 = vst [vmem:[%s111_s25 + $0x8] sm:$0xff] (%p494_p4), %v149_v1  ;;  %v153_v3 = vld [vmem:[%s113_s24 + $0x30] sm:$0xff] (%p494_p4) }
  0x16   : > { %152 = vst [vmem:[%s111_s25 + $0x10] sm:$0xff] (%p494_p4), %v151_v2  ;;  %154 = vst [vmem:[%s111_s25 + $0x18] sm:$0xff] (%p494_p4), %v153_v3 }
  0x18 PF: > { %160 = sbr.rel (!%p494_p4) target bundleno = 31 (0x1f), region = 58  ;;  %s162_s26 = sand.u32 (%p494_p4), 1, %s443_s10  }
  0x19   : > { %s387_s27 = sshll.u32 (%p494_p4), %s447_s11, 3  ;;  %s386_s28 = sshll.u32 (%p494_p4), %s162_s26, 4 }
  0x1a   : > { %s166_s3 = scalar_lea.vmem (%p494_p4), %s538_s1, %s387_s27  ;;  %s164_s4 = scalar_lea.vmem (%p494_p4), [#allocation3], %s386_s28 }
  0x1b   : > { %v196_v4 = vld [vmem:[%s166_s3] sm:$0xff] (%p494_p4)  ;;  %v198_v5 = vld [vmem:[%s166_s3 + $0x10] sm:$0xff] (%p494_p4) }
  0x1c   : > { %197 = vst [vmem:[%s164_s4] sm:$0xff] (%p494_p4), %v196_v4  ;;  %199 = vst [vmem:[%s164_s4 + $0x8] sm:$0xff] (%p494_p4), %v198_v5 }
  0x1f PF: > { %p388_p7 = scmp.ge.s32.totalorder %s447_s11, 1  ;;  %p204_p8 = scmp.lt.s32.totalorder %s447_s11, 3 }
  0x21   : > { %p205_p9 = pnand %p388_p7, %p204_p8 }
  0x22   : > { %s211_s5 = sand.u32 (!%p205_p9), 1, %s439_s9  }
  0x23   : > { %208 = sbr.rel (%p205_p9) target bundleno = 54 (0x36), region = 96  ;;  %s389_s6 = sshll.u32 (!%p205_p9), %s211_s5, 5 }
  0x24   : > { %s390_s7 = sshll.u32 (!%p205_p9), %s211_s5, 4  ;;  %s213_s8 = scalar_lea.vmem (!%p205_p9), [#allocation2], %s389_s6 }
  0x25   : > { %v242_v6 = vld [vmem:[%s213_s8] sm:$0xff] (!%p205_p9)  ;;  %v392_v7 = vld [vmem:[%s213_s8 + $0x8] sm:$0xff] (!%p205_p9)  ;;  %v394_v8 = vld [vmem:[%s213_s8 + $0x18] sm:$0xff] (!%p205_p9)  ;;  %s220_s14 = scalar_lea.vmem (!%p205_p9), [#allocation3], %s390_s7  ;;  %s241_s15 = scalar_lea.vmem (!%p205_p9), [#allocation4], %s390_s7 }
  0x26   : > { %v249_v9 = vld [vmem:[%s220_s14] sm:$0xff] (!%p205_p9)  ;;  %v395_v10 = vld [vmem:[%s220_s14 + $0x8] sm:$0xff] (!%p205_p9) }
  0x27   : > { %v393_v11 = vld [vmem:[%s213_s8 + $0x10] sm:$0xff] (!%p205_p9)  ;;  %v252_v12 = vmul.f32 (!%p205_p9), %v395_v10, %v392_v7  ;;  %v256_v13 = vmul.f32 (!%p205_p9), %v394_v8, %v249_v9 }
  0x29   : > { %v253_v14 = vsub.f32 (!%p205_p9), %v242_v6, %v252_v12  ;;  %v257_v15 = vsub.f32 (!%p205_p9), %v256_v13, %v393_v11 }
  0x2a   : > { %267 = sbr.rel (!%p498_p5) target bundleno = 54 (0x36), region = 108  ;;  %s398_s9 = sshll.u32 (%p498_p5), %s380_s12, 3 }
  0x2b   : > { %v254_v16 = vmul.f32 %v253_v14, %v249_v9  ;;  %v258_v17 = vmul.f32 %v395_v10, %v257_v15  ;;  %s269_s20 = scalar_lea.vmem (%p498_p5), %s539_s2, %s398_s9 }
  0x2d   : > { %255 = vst [vmem:[%s241_s15] sm:$0xff] %v254_v16  ;;  %396 = vst [vmem:[%s241_s15 + $0x8] sm:$0xff] %v258_v17 }
  0x34   : > { %v299_v18 = vld [vmem:[%s241_s15] sm:$0xff]  ;;  %v301_v19 = vld [vmem:[%s241_s15 + $0x8] sm:$0xff] }
  0x35   : > { %300 = vst [vmem:[%s269_s20] sm:$0xff] %v299_v18  ;;  %302 = vst [vmem:[%s269_s20 + $0x10] sm:$0xff] %v301_v19 }
  0x36 PF: > { %p9_p10 = scmp.ge.s32.totalorder %s481_s13, 4   ;;  %s542_s9 = smov %s443_s10 }
  0x37   : > { %s543_s10 = smov %s492_s16  ;;  %s544_s11 = smov %s481_s13 }
  0x38   :  { %11 = sbr.rel (!%p9_p10) target bundleno = 2 (0x2), region = 190 }

</bundles_post_ra>
